<compile_context>
chip_gen: v7x
topology: tpu7x:2x2x1
jax: 0.10.0
libtpu: 0.0.40
codegen_flags: <defaults>
</compile_context>

<pallas_src>
import functools

import jax
import jax.numpy as jnp
from jax.experimental import pallas as pl
from jax.experimental.pallas import tpu as pltpu


def _round_up(v, m):
    return (v + m - 1) // m * m


def _vmem_limit_bytes():
    """Scoped-VMEM limit: 75% of physical, conservative v7x fallback."""
    try:
        cap = int(pltpu.get_tpu_info().vmem_capacity_bytes)
    except Exception:
        cap = 64 * 1024 * 1024          # v7x has the smallest physical VMEM
    return max(32 * 1024 * 1024, int(cap * 0.75))


# ---------------------------------------------------------------------------
# Fused path (x resident in VMEM): one kernel, x read from HBM exactly once.
# ---------------------------------------------------------------------------
def _fused_kernel(starts_c_ref, ends_c_ref, invcnt_ref, starts_r_ref,
                  ends_r_ref, x_ref, w2t_ref, b2_ref, w1b_ref, b1_ref,
                  w1a_ref, scale_ref, shift_ref, y_ref):
    n = x_ref.shape[0]
    b_pad = starts_c_ref.shape[0]

    x = x_ref[...]

    # Segment sums on the MXU: one-hot (B_pad, N) @ (N, C).
    col = jax.lax.broadcasted_iota(jnp.int32, (b_pad, n), 1)
    seg = ((col >= starts_c_ref[...]) & (col < ends_c_ref[...])).astype(x.dtype)
    ssum = jnp.dot(seg, x, preferred_element_type=jnp.float32)

    mean = ssum * invcnt_ref[...]                                   # (B_pad, C)
    g = jnp.maximum(
        jnp.dot(mean, w2t_ref[...], preferred_element_type=jnp.float32)
        + b2_ref[...], 0.0)
    u = jnp.dot(g, w1b_ref[...],
                preferred_element_type=jnp.float32) + b1_ref[...]   # (B_pad, Co)

    # Per-row gather of the gate term via a one-hot matmul.
    row = jax.lax.broadcasted_iota(jnp.int32, (n, 1), 0)
    onehot = ((row >= starts_r_ref[...]) &
              (row < ends_r_ref[...])).astype(jnp.float32)          # (N, B_pad)
    gate = jnp.dot(onehot, u, preferred_element_type=jnp.float32)

    acc = jnp.dot(x, w1a_ref[...], preferred_element_type=jnp.float32) + gate
    y = jnp.maximum(acc * scale_ref[...] + shift_ref[...], 0.0)
    y_ref[...] = y.astype(y_ref.dtype)


# ---------------------------------------------------------------------------
# Two-pass fallback, pass 1: per-slice segment partial sums (MXU one-hot).
# Grid = (n_slices, tiles_per_slice); slice axis is "parallel" (v7x 2-TC).
# ---------------------------------------------------------------------------
def _seg_psum_kernel(starts_ref, ends_ref, x_ref, psum_ref, *,
                     n_total, tiles_per_slice):
    s = pl.program_id(0)
    i = pl.program_id(1)
    tm = x_ref.shape[0]

    @pl.when(i == 0)
    def _():
        psum_ref[...] = jnp.zeros_like(psum_ref)

    base = (s * tiles_per_slice + i) * tm
    col = jax.lax.broadcasted_iota(jnp.int32, (1, tm), 1) + base     # (1, TM)
    rowc = jax.lax.broadcasted_iota(jnp.int32, (tm, 1), 0) + base    # (TM, 1)

    # Zero rows past N (partial / duplicated last tile) before the MXU.
    x = x_ref[...]
    x = jnp.where(rowc < n_total, x, jnp.zeros_like(x))

    onehot = ((col >= starts_ref[...]) &
              (col < ends_ref[...])).astype(x.dtype)                 # (B_pad, TM)
    psum_ref[...] += jnp.dot(onehot, x, preferred_element_type=jnp.float32)


# ---------------------------------------------------------------------------
# Two-pass fallback, pass 2: row-parallel main epilogue.  The tiny per-segment
# gate u is rebuilt from the partial sums per tile (cost << tile matmul).
# ---------------------------------------------------------------------------
def _epilogue_kernel(starts_r_ref, ends_r_ref, invcnt_ref, x_ref, psum_ref,
                     w2t_ref, b2_ref, w1b_ref, b1_ref, w1a_ref,
                     scale_ref, shift_ref, y_ref):
    i = pl.program_id(0)
    tm = x_ref.shape[0]

    ssum = jnp.sum(psum_ref[...], axis=0)                            # (B_pad, C)
    mean = ssum * invcnt_ref[...]
    g = jnp.maximum(
        jnp.dot(mean, w2t_ref[...], preferred_element_type=jnp.float32)
        + b2_ref[...], 0.0)
    u = jnp.dot(g, w1b_ref[...],
                preferred_element_type=jnp.float32) + b1_ref[...]    # (B_pad, Co)

    row = jax.lax.broadcasted_iota(jnp.int32, (tm, 1), 0) + i * tm   # (TM, 1)
    onehot = ((row >= starts_r_ref[...]) &
              (row < ends_r_ref[...])).astype(jnp.float32)           # (TM, B_pad)
    gate = jnp.dot(onehot, u, preferred_element_type=jnp.float32)

    acc = jnp.dot(x_ref[...], w1a_ref[...],
                  preferred_element_type=jnp.float32) + gate
    y = jnp.maximum(acc * scale_ref[...] + shift_ref[...], 0.0)
    y_ref[...] = y.astype(y_ref.dtype)


# ---------------------------------------------------------------------------
# Wrapper
# ---------------------------------------------------------------------------
def transition_up(x, o, w1, b1, bn_gamma, bn_beta, bn_mean, bn_var, w2, b2,
                  eps=1e-5, tm=None, pad_out_lanes=False,
                  force_two_pass=False):
    """x: (N, C), o: (B,) int32 cumulative offsets (o[-1] == N).

    Streams x / W1a / y in x.dtype (use bf16 for ~2x HBM traffic reduction);
    all accumulation and the gate / BN / ReLU math stay f32.
    """
    n, c = x.shape
    b = o.shape[0]
    io_dtype = x.dtype
    elt = jnp.dtype(io_dtype).itemsize

    # Rows beyond o[-1] would silently get gate=0; the reference drops them.
    try:
        last = int(o[-1])
    except Exception:
        last = None
    if last is not None and last != n:
        raise ValueError("o[-1] must equal x.shape[0]")

    c_out = _round_up(c, 128) if pad_out_lanes else c

    # Split Linear1 weight into x-half and gate-half (z = [x, gate]).
    w1t = w1.astype(jnp.float32).T                      # (2C, C)
    w1a = w1t[:c, :]                                    # multiplies x
    w1b = w1t[c:, :]                                    # multiplies gate
    w2t = w2.astype(jnp.float32).T                      # (C, C)

    # Fold inference BatchNorm1d into an affine scale/shift.
    scale = (bn_gamma / jnp.sqrt(bn_var + eps)).astype(jnp.float32)
    shift = (bn_beta - bn_mean * scale).astype(jnp.float32)
    b1_f = b1.astype(jnp.float32)

    if c_out != c:
        pc = c_out - c
        w1a = jnp.pad(w1a, ((0, 0), (0, pc)))
        w1b = jnp.pad(w1b, ((0, 0), (0, pc)))
        b1_f = jnp.pad(b1_f, (0, pc))
        scale = jnp.pad(scale, (0, pc))
        shift = jnp.pad(shift, (0, pc))

    w1a = w1a.astype(io_dtype)                 # streamed with x through the MXU
    b1_ = b1_f.reshape(1, c_out)
    b2_ = b2.astype(jnp.float32).reshape(1, c)
    scale_ = scale.reshape(1, c_out)
    shift_ = shift.reshape(1, c_out)

    # Segment boundary tables, padded to a multiple of 8 segments.
    b_pad = max(8, _round_up(b, 8))
    starts = jnp.concatenate(
        [jnp.zeros((1,), jnp.int32), o[:-1].astype(jnp.int32)])
    ends = o.astype(jnp.int32)
    counts = ends - starts
    invcnt = 1.0 / jnp.maximum(counts, 1).astype(jnp.float32)   # empty-seg guard
    pad = b_pad - b
    starts_p = jnp.pad(starts, (0, pad), constant_values=n)
    ends_p = jnp.pad(ends, (0, pad), constant_values=n)
    invcnt_p = jnp.pad(invcnt, (0, pad))

    starts_col = starts_p.reshape(b_pad, 1)
    ends_col = ends_p.reshape(b_pad, 1)
    invcnt_col = invcnt_p.reshape(b_pad, 1)
    starts_row = starts_p.reshape(1, b_pad)
    ends_row = ends_p.reshape(1, b_pad)

    # ---- VMEM-aware sizing --------------------------------------------------
    vmem_limit = _vmem_limit_bytes()
    resident = 2 * (c * c_out * elt            # w1a (io dtype, double-buffered)
                    + c * c * 4 + c * c_out * 4        # w2t, w1b (f32)
                    + 4 * c_out * 4                    # b1/b2/scale/shift rows
                    + 2 * b_pad * c * 4                # pass-1 partial sums
                    + 8 * b_pad * 4)                   # segment tables

    if tm is None:
        per_row = 2 * c * elt + 2 * c_out * elt        # dbl-buffered x + y tiles
        tm_fit = max(256, (vmem_limit - resident - (2 << 20)) // max(per_row, 1))
        tm_cap = max(256, (4 << 20) // max(c * elt, c_out * elt))  # ~4 MiB block
        tm = min(tm_fit, tm_cap)
    tm = _round_up(max(16, min(tm, _round_up(n, 16))), 16)
    num_tiles = (n + tm - 1) // tm

    cp_common = dict(vmem_limit_bytes=int(vmem_limit))

    # ---- fused single-read path when x (+ intermediates) fits VMEM ----------
    fused_bytes = (n * c * elt + n * c_out * elt       # x in, y out
                   + n * c_out * 4                     # f32 accumulator
                   + 2 * n * b_pad * 4                 # one-hot matrices
                   + resident)
    use_fused = (not force_two_pass) and fused_bytes <= int(vmem_limit * 0.45)

    if use_fused:
        flops = (2 * n * c * c_out + 2 * n * b_pad * (c + c_out)
                 + 4 * b_pad * c * c_out)
        y_full = pl.pallas_call(
            _fused_kernel,
            out_shape=jax.ShapeDtypeStruct((n, c_out), io_dtype),
            grid=(1,),
            in_specs=[
                pl.BlockSpec((b_pad, 1), lambda i: (0, 0)),
                pl.BlockSpec((b_pad, 1), lambda i: (0, 0)),
                pl.BlockSpec((b_pad, 1), lambda i: (0, 0)),
                pl.BlockSpec((1, b_pad), lambda i: (0, 0)),
                pl.BlockSpec((1, b_pad), lambda i: (0, 0)),
                pl.BlockSpec((n, c), lambda i: (0, 0)),
                pl.BlockSpec((c, c), lambda i: (0, 0)),
                pl.BlockSpec((1, c), lambda i: (0, 0)),
                pl.BlockSpec((c, c_out), lambda i: (0, 0)),
                pl.BlockSpec((1, c_out), lambda i: (0, 0)),
                pl.BlockSpec((c, c_out), lambda i: (0, 0)),
                pl.BlockSpec((1, c_out), lambda i: (0, 0)),
                pl.BlockSpec((1, c_out), lambda i: (0, 0)),
            ],
            out_specs=pl.BlockSpec((n, c_out), lambda i: (0, 0)),
            compiler_params=pltpu.CompilerParams(
                dimension_semantics=("arbitrary",), **cp_common),
            cost_estimate=pl.CostEstimate(
                flops=int(flops), transcendentals=0,
                bytes_accessed=int(n * c * elt + n * c_out * elt + resident)),
        )(starts_col, ends_col, invcnt_col, starts_row, ends_row,
          x, w2t, b2_, w1b, b1_, w1a, scale_, shift_)
        return y_full[:, :c] if c_out != c else y_full

    # ---- two-pass tiled path (large N) --------------------------------------
    n_slices = 2 if num_tiles >= 2 else 1          # shards pass-1 across v7x TCs
    tiles_per_slice = (num_tiles + n_slices - 1) // n_slices
    last_tile = num_tiles - 1

    def x_map_p1(s, i):
        # Clamp the (possibly over-provisioned) tile index; duplicated tiles
        # contribute zero because the kernel masks rows >= N.
        return (jnp.minimum(s * tiles_per_slice + i, last_tile), 0)

    psums = pl.pallas_call(
        functools.partial(_seg_psum_kernel, n_total=n,
                          tiles_per_slice=tiles_per_slice),
        out_shape=jax.ShapeDtypeStruct((n_slices, b_pad, c), jnp.float32),
        grid=(n_slices, tiles_per_slice),
        in_specs=[
            pl.BlockSpec((b_pad, 1), lambda s, i: (0, 0)),
            pl.BlockSpec((b_pad, 1), lambda s, i: (0, 0)),
            pl.BlockSpec((tm, c), x_map_p1),
        ],
        out_specs=pl.BlockSpec((None, b_pad, c), lambda s, i: (s, 0, 0)),
        compiler_params=pltpu.CompilerParams(
            dimension_semantics=("parallel", "arbitrary"), **cp_common),
        cost_estimate=pl.CostEstimate(
            flops=int(2 * n * b_pad * c), transcendentals=0,
            bytes_accessed=int(n * c * elt + n_slices * b_pad * c * 4)),
    )(starts_col, ends_col, x)

    flops2 = (2 * n * c * c_out + 2 * n * b_pad * c_out
              + num_tiles * 4 * b_pad * c * c_out)
    y_full = pl.pallas_call(
        _epilogue_kernel,
        out_shape=jax.ShapeDtypeStruct((n, c_out), io_dtype),
        grid=(num_tiles,),
        in_specs=[
            pl.BlockSpec((1, b_pad), lambda i: (0, 0)),
            pl.BlockSpec((1, b_pad), lambda i: (0, 0)),
            pl.BlockSpec((b_pad, 1), lambda i: (0, 0)),
            pl.BlockSpec((tm, c), lambda i: (i, 0)),
            pl.BlockSpec((n_slices, b_pad, c), lambda i: (0, 0, 0)),
            pl.BlockSpec((c, c), lambda i: (0, 0)),
            pl.BlockSpec((1, c), lambda i: (0, 0)),
            pl.BlockSpec((c, c_out), lambda i: (0, 0)),
            pl.BlockSpec((1, c_out), lambda i: (0, 0)),
            pl.BlockSpec((c, c_out), lambda i: (0, 0)),
            pl.BlockSpec((1, c_out), lambda i: (0, 0)),
            pl.BlockSpec((1, c_out), lambda i: (0, 0)),
        ],
        out_specs=pl.BlockSpec((tm, c_out), lambda i: (i, 0)),
        compiler_params=pltpu.CompilerParams(
            dimension_semantics=("parallel",), **cp_common),
        cost_estimate=pl.CostEstimate(
            flops=int(flops2), transcendentals=0,
            bytes_accessed=int(n * c * elt + n * c_out * elt
                               + n_slices * b_pad * c * 4 + resident)),
    )(starts_row, ends_row, invcnt_col, x, psums,
      w2t, b2_, w1b, b1_, w1a, scale_, shift_)
    return y_full[:, :c] if c_out != c else y_full


def transition_up_ref(x, o, w1, b1, bn_gamma, bn_beta, bn_mean, bn_var,
                      w2, b2, eps=1e-5):
    """Pure-JAX mirror of the PyTorch forward (pxo2 is None branch)."""
    outs = []
    start = 0
    for i in range(o.shape[0]):
        end = int(o[i])
        cnt = end - start
        xb = x[start:end, :]
        m = xb.sum(0, keepdims=True) / cnt
        g = jnp.maximum(m @ w2.T + b2, 0.0)
        g = jnp.tile(g, (cnt, 1))
        outs.append(jnp.concatenate([xb, g], axis=1))
        start = end
    z = jnp.concatenate(outs, axis=0)
    h = z @ w1.T + b1
    h = bn_gamma * (h - bn_mean) / jnp.sqrt(bn_var + eps) + bn_beta
    return jnp.maximum(h, 0.0)


if __name__ == "__main__":
    key = jax.random.PRNGKey(0)
    in_planes = 32          # C
    n_points = 44           # total points (exercises a partial last tile)
    o = jnp.array([20, 44], dtype=jnp.int32)   # 2 batches: 20 and 24 points

    ks = jax.random.split(key, 8)
    x = jax.random.normal(ks[0], (n_points, in_planes), dtype=jnp.float32)

    # linear1: Linear(2C -> C) + BatchNorm1d(C) + ReLU
    w1 = 0.1 * jax.random.normal(ks[1], (in_planes, 2 * in_planes), jnp.float32)
    b1 = 0.1 * jax.random.normal(ks[2], (in_planes,), jnp.float32)
    bn_gamma = 1.0 + 0.05 * jax.random.normal(ks[3], (in_planes,), jnp.float32)
    bn_beta = 0.05 * jax.random.normal(ks[4], (in_planes,), jnp.float32)
    bn_mean = 0.05 * jax.random.normal(ks[5], (in_planes,), jnp.float32)
    bn_var = 1.0 + 0.1 * jnp.abs(jax.random.normal(ks[6], (in_planes,),
                                                   jnp.float32))
    # linear2: Linear(C -> C) + ReLU
    w2 = 0.1 * jax.random.normal(ks[7], (in_planes, in_planes), jnp.float32)
    b2 = 0.1 * jnp.ones((in_planes,), jnp.float32)

    y_ref = transition_up_ref(x, o, w1, b1, bn_gamma, bn_beta, bn_mean,
                              bn_var, w2, b2)

    # 1) Auto configuration: small N -> fused single-read kernel, f32 I/O.
    y_fused = jax.block_until_ready(
        transition_up(x, o, w1, b1, bn_gamma, bn_beta, bn_mean, bn_var,
                      w2, b2))
    assert jnp.allclose(y_fused, y_ref, atol=1e-4, rtol=1e-4), \
        float(jnp.max(jnp.abs(y_fused - y_ref)))

    # 2) Two-pass tiled fallback with a tiny tile: exercises multi-tile
    #    accumulation, the 2-slice (megacore-friendly) pass-1 reduction and
    #    the row-parallel epilogue.
    y_2p = jax.block_until_ready(
        transition_up(x, o, w1, b1, bn_gamma, bn_beta, bn_mean, bn_var,
                      w2, b2, tm=16, force_two_pass=True))
    assert jnp.allclose(y_2p, y_ref, atol=1e-4, rtol=1e-4), \
        float(jnp.max(jnp.abs(y_2p - y_ref)))

    # 3) bf16 streaming + lane-padded (128-wide) output stores; accumulation
    #    stays f32, so only I/O precision drops.
    y_bf16 = jax.block_until_ready(
        transition_up(x.astype(jnp.bfloat16), o, w1, b1, bn_gamma, bn_beta,
                      bn_mean, bn_var, w2, b2, tm=16, force_two_pass=True,
                      pad_out_lanes=True))
    err = jnp.max(jnp.abs(y_bf16.astype(jnp.float32) - y_ref))
    assert jnp.allclose(y_bf16.astype(jnp.float32), y_ref,
                        atol=7e-2, rtol=7e-2), float(err)

    print("KERNEL_OK")
</pallas_src>

<mosaic_0001>
module attributes {stable_mosaic.version = 11 : i64} {
  func.func @_fused_kernel(%arg0: i32, %arg1: memref<8x1xi32, #tpu.memory_space<vmem>>, %arg2: memref<8x1xi32, #tpu.memory_space<vmem>>, %arg3: memref<8x1xf32, #tpu.memory_space<vmem>>, %arg4: memref<1x8xi32, #tpu.memory_space<vmem>>, %arg5: memref<1x8xi32, #tpu.memory_space<vmem>>, %arg6: memref<44x32xf32, #tpu.memory_space<vmem>>, %arg7: memref<32x32xf32, #tpu.memory_space<vmem>>, %arg8: memref<1x32xf32, #tpu.memory_space<vmem>>, %arg9: memref<32x32xf32, #tpu.memory_space<vmem>>, %arg10: memref<1x32xf32, #tpu.memory_space<vmem>>, %arg11: memref<32x32xf32, #tpu.memory_space<vmem>>, %arg12: memref<1x32xf32, #tpu.memory_space<vmem>>, %arg13: memref<1x32xf32, #tpu.memory_space<vmem>>, %arg14: memref<44x32xf32, #tpu.memory_space<vmem>>) attributes {dimension_semantics = [#tpu.dimension_semantics<arbitrary>], iteration_bounds = array<i64: 1>, scalar_prefetch = 0 : i64, scratch_operands = 0 : i64, tpu.core_type = #tpu.core_type<tc>, window_params = [{pipeline_mode = #tpu.pipeline_mode<synchronous>, transform_indices = @transform_0, window_bounds = array<i64: 8, 1>}, {pipeline_mode = #tpu.pipeline_mode<synchronous>, transform_indices = @transform_1, window_bounds = array<i64: 8, 1>}, {pipeline_mode = #tpu.pipeline_mode<synchronous>, transform_indices = @transform_2, window_bounds = array<i64: 8, 1>}, {pipeline_mode = #tpu.pipeline_mode<synchronous>, transform_indices = @transform_3, window_bounds = array<i64: 1, 8>}, {pipeline_mode = #tpu.pipeline_mode<synchronous>, transform_indices = @transform_4, window_bounds = array<i64: 1, 8>}, {pipeline_mode = #tpu.pipeline_mode<synchronous>, transform_indices = @transform_5, window_bounds = array<i64: 44, 32>}, {pipeline_mode = #tpu.pipeline_mode<synchronous>, transform_indices = @transform_6, window_bounds = array<i64: 32, 32>}, {pipeline_mode = #tpu.pipeline_mode<synchronous>, transform_indices = @transform_7, window_bounds = array<i64: 1, 32>}, {pipeline_mode = #tpu.pipeline_mode<synchronous>, transform_indices = @transform_8, window_bounds = array<i64: 32, 32>}, {pipeline_mode = #tpu.pipeline_mode<synchronous>, transform_indices = @transform_9, window_bounds = array<i64: 1, 32>}, {pipeline_mode = #tpu.pipeline_mode<synchronous>, transform_indices = @transform_10, window_bounds = array<i64: 32, 32>}, {pipeline_mode = #tpu.pipeline_mode<synchronous>, transform_indices = @transform_11, window_bounds = array<i64: 1, 32>}, {pipeline_mode = #tpu.pipeline_mode<synchronous>, transform_indices = @transform_12, window_bounds = array<i64: 1, 32>}, {pipeline_mode = #tpu.pipeline_mode<synchronous>, transform_indices = @transform_13, window_bounds = array<i64: 44, 32>}]} {
    %c0 = arith.constant 0 : index
    %c0_0 = arith.constant 0 : index
    %0 = vector.load %arg6[%c0, %c0_0] : memref<44x32xf32, #tpu.memory_space<vmem>>, vector<44x32xf32>
    %1 = tpu.iota {dimensions = array<i32: 1>} : vector<8x44xi32>
    %c0_1 = arith.constant 0 : index
    %c0_2 = arith.constant 0 : index
    %2 = vector.load %arg1[%c0_1, %c0_2] : memref<8x1xi32, #tpu.memory_space<vmem>>, vector<8x1xi32>
    %3 = vector.broadcast %2 : vector<8x1xi32> to vector<8x44xi32>
    %4 = arith.cmpi sge, %1, %3 : vector<8x44xi32>
    %c0_3 = arith.constant 0 : index
    %c0_4 = arith.constant 0 : index
    %5 = vector.load %arg2[%c0_3, %c0_4] : memref<8x1xi32, #tpu.memory_space<vmem>>, vector<8x1xi32>
    %6 = vector.broadcast %5 : vector<8x1xi32> to vector<8x44xi32>
    %7 = arith.cmpi slt, %1, %6 : vector<8x44xi32>
    %8 = arith.andi %4, %7 : vector<8x44xi1>
    %9 = arith.extui %8 : vector<8x44xi1> to vector<8x44xi32>
    %10 = arith.sitofp %9 : vector<8x44xi32> to vector<8x44xf32>
    %cst = arith.constant dense<0.000000e+00> : vector<8x32xf32>
    %11 = tpu.matmul %10, %0, %cst {dimension_numbers = #tpu.dot_dimension_numbers<[1], [0], [0], [1], [0, 0, 1, 1], [], []>} : vector<8x44xf32>, vector<44x32xf32>, vector<8x32xf32> -> vector<8x32xf32>
    %c0_5 = arith.constant 0 : index
    %c0_6 = arith.constant 0 : index
    %12 = vector.load %arg3[%c0_5, %c0_6] : memref<8x1xf32, #tpu.memory_space<vmem>>, vector<8x1xf32>
    %13 = vector.broadcast %12 : vector<8x1xf32> to vector<8x32xf32>
    %14 = arith.mulf %11, %13 : vector<8x32xf32>
    %c0_7 = arith.constant 0 : index
    %c0_8 = arith.constant 0 : index
    %15 = vector.load %arg7[%c0_7, %c0_8] : memref<32x32xf32, #tpu.memory_space<vmem>>, vector<32x32xf32>
    %cst_9 = arith.constant dense<0.000000e+00> : vector<8x32xf32>
    %16 = tpu.matmul %14, %15, %cst_9 {dimension_numbers = #tpu.dot_dimension_numbers<[1], [0], [0], [1], [0, 0, 1, 1], [], []>} : vector<8x32xf32>, vector<32x32xf32>, vector<8x32xf32> -> vector<8x32xf32>
    %c0_10 = arith.constant 0 : index
    %c0_11 = arith.constant 0 : index
    %17 = vector.load %arg8[%c0_10, %c0_11] : memref<1x32xf32, #tpu.memory_space<vmem>>, vector<1x32xf32>
    %18 = vector.broadcast %17 : vector<1x32xf32> to vector<8x32xf32>
    %19 = arith.addf %16, %18 : vector<8x32xf32>
    %cst_12 = arith.constant 0.000000e+00 : f32
    %20 = vector.broadcast %cst_12 : f32 to vector<8x32xf32>
    %21 = arith.maximumf %19, %20 : vector<8x32xf32>
    %c0_13 = arith.constant 0 : index
    %c0_14 = arith.constant 0 : index
    %22 = vector.load %arg9[%c0_13, %c0_14] : memref<32x32xf32, #tpu.memory_space<vmem>>, vector<32x32xf32>
    %cst_15 = arith.constant dense<0.000000e+00> : vector<8x32xf32>
    %23 = tpu.matmul %21, %22, %cst_15 {dimension_numbers = #tpu.dot_dimension_numbers<[1], [0], [0], [1], [0, 0, 1, 1], [], []>} : vector<8x32xf32>, vector<32x32xf32>, vector<8x32xf32> -> vector<8x32xf32>
    %c0_16 = arith.constant 0 : index
    %c0_17 = arith.constant 0 : index
    %24 = vector.load %arg10[%c0_16, %c0_17] : memref<1x32xf32, #tpu.memory_space<vmem>>, vector<1x32xf32>
    %25 = vector.broadcast %24 : vector<1x32xf32> to vector<8x32xf32>
    %26 = arith.addf %23, %25 : vector<8x32xf32>
    %27 = tpu.iota {dimensions = array<i32: 0>} : vector<44x1xi32>
    %c0_18 = arith.constant 0 : index
    %c0_19 = arith.constant 0 : index
    %28 = vector.load %arg4[%c0_18, %c0_19] : memref<1x8xi32, #tpu.memory_space<vmem>>, vector<1x8xi32>
    %29 = vector.broadcast %27 : vector<44x1xi32> to vector<44x8xi32>
    %30 = vector.broadcast %28 : vector<1x8xi32> to vector<44x8xi32>
    %31 = arith.cmpi sge, %29, %30 : vector<44x8xi32>
    %c0_20 = arith.constant 0 : index
    %c0_21 = arith.constant 0 : index
    %32 = vector.load %arg5[%c0_20, %c0_21] : memref<1x8xi32, #tpu.memory_space<vmem>>, vector<1x8xi32>
    %33 = vector.broadcast %27 : vector<44x1xi32> to vector<44x8xi32>
    %34 = vector.broadcast %32 : vector<1x8xi32> to vector<44x8xi32>
    %35 = arith.cmpi slt, %33, %34 : vector<44x8xi32>
    %36 = arith.andi %31, %35 : vector<44x8xi1>
    %37 = arith.extui %36 : vector<44x8xi1> to vector<44x8xi32>
    %38 = arith.sitofp %37 : vector<44x8xi32> to vector<44x8xf32>
    %cst_22 = arith.constant dense<0.000000e+00> : vector<44x32xf32>
    %39 = tpu.matmul %38, %26, %cst_22 {dimension_numbers = #tpu.dot_dimension_numbers<[1], [0], [0], [1], [0, 0, 1, 1], [], []>} : vector<44x8xf32>, vector<8x32xf32>, vector<44x32xf32> -> vector<44x32xf32>
    %c0_23 = arith.constant 0 : index
    %c0_24 = arith.constant 0 : index
    %40 = vector.load %arg11[%c0_23, %c0_24] : memref<32x32xf32, #tpu.memory_space<vmem>>, vector<32x32xf32>
    %cst_25 = arith.constant dense<0.000000e+00> : vector<44x32xf32>
    %41 = tpu.matmul %0, %40, %cst_25 {dimension_numbers = #tpu.dot_dimension_numbers<[1], [0], [0], [1], [0, 0, 1, 1], [], []>} : vector<44x32xf32>, vector<32x32xf32>, vector<44x32xf32> -> vector<44x32xf32>
    %42 = arith.addf %41, %39 : vector<44x32xf32>
    %c0_26 = arith.constant 0 : index
    %c0_27 = arith.constant 0 : index
    %43 = vector.load %arg12[%c0_26, %c0_27] : memref<1x32xf32, #tpu.memory_space<vmem>>, vector<1x32xf32>
    %44 = vector.broadcast %43 : vector<1x32xf32> to vector<44x32xf32>
    %45 = arith.mulf %42, %44 : vector<44x32xf32>
    %c0_28 = arith.constant 0 : index
    %c0_29 = arith.constant 0 : index
    %46 = vector.load %arg13[%c0_28, %c0_29] : memref<1x32xf32, #tpu.memory_space<vmem>>, vector<1x32xf32>
    %47 = vector.broadcast %46 : vector<1x32xf32> to vector<44x32xf32>
    %48 = arith.addf %45, %47 : vector<44x32xf32>
    %cst_30 = arith.constant 0.000000e+00 : f32
    %49 = vector.broadcast %cst_30 : f32 to vector<44x32xf32>
    %50 = arith.maximumf %48, %49 : vector<44x32xf32>
    %c0_31 = arith.constant 0 : index
    %c0_32 = arith.constant 0 : index
    %51 = vector.load %arg14[%c0_31, %c0_32] : memref<44x32xf32, #tpu.memory_space<vmem>>, vector<44x32xf32>
    tpu.vector_store %arg14[%c0_31, %c0_32], %50 {strides = array<i32>} : memref<44x32xf32, #tpu.memory_space<vmem>>, vector<44x32xf32>,
    return
  }
  func.func @transform_0(%arg0: i32) -> (i32, i32) {
    %c0_i32 = arith.constant 0 : i32
    %c0_i32_0 = arith.constant 0 : i32
    %c0_i32_1 = arith.constant 0 : i32
    return %c0_i32, %c0_i32_0 : i32, i32
  }
  func.func @transform_1(%arg0: i32) -> (i32, i32) {
    %c0_i32 = arith.constant 0 : i32
    %c0_i32_0 = arith.constant 0 : i32
    %c0_i32_1 = arith.constant 0 : i32
    return %c0_i32, %c0_i32_0 : i32, i32
  }
  func.func @transform_2(%arg0: i32) -> (i32, i32) {
    %c0_i32 = arith.constant 0 : i32
    %c0_i32_0 = arith.constant 0 : i32
    %c0_i32_1 = arith.constant 0 : i32
    return %c0_i32, %c0_i32_0 : i32, i32
  }
  func.func @transform_3(%arg0: i32) -> (i32, i32) {
    %c0_i32 = arith.constant 0 : i32
    %c0_i32_0 = arith.constant 0 : i32
    %c0_i32_1 = arith.constant 0 : i32
    return %c0_i32, %c0_i32_0 : i32, i32
  }
  func.func @transform_4(%arg0: i32) -> (i32, i32) {
    %c0_i32 = arith.constant 0 : i32
    %c0_i32_0 = arith.constant 0 : i32
    %c0_i32_1 = arith.constant 0 : i32
    return %c0_i32, %c0_i32_0 : i32, i32
  }
  func.func @transform_5(%arg0: i32) -> (i32, i32) {
    %c0_i32 = arith.constant 0 : i32
    %c0_i32_0 = arith.constant 0 : i32
    %c0_i32_1 = arith.constant 0 : i32
    return %c0_i32, %c0_i32_0 : i32, i32
  }
  func.func @transform_6(%arg0: i32) -> (i32, i32) {
    %c0_i32 = arith.constant 0 : i32
    %c0_i32_0 = arith.constant 0 : i32
    %c0_i32_1 = arith.constant 0 : i32
    return %c0_i32, %c0_i32_0 : i32, i32
  }
  func.func @transform_7(%arg0: i32) -> (i32, i32) {
    %c0_i32 = arith.constant 0 : i32
    %c0_i32_0 = arith.constant 0 : i32
    %c0_i32_1 = arith.constant 0 : i32
    return %c0_i32, %c0_i32_0 : i32, i32
  }
  func.func @transform_8(%arg0: i32) -> (i32, i32) {
    %c0_i32 = arith.constant 0 : i32
    %c0_i32_0 = arith.constant 0 : i32
    %c0_i32_1 = arith.constant 0 : i32
    return %c0_i32, %c0_i32_0 : i32, i32
  }
  func.func @transform_9(%arg0: i32) -> (i32, i32) {
    %c0_i32 = arith.constant 0 : i32
    %c0_i32_0 = arith.constant 0 : i32
    %c0_i32_1 = arith.constant 0 : i32
    return %c0_i32, %c0_i32_0 : i32, i32
  }
  func.func @transform_10(%arg0: i32) -> (i32, i32) {
    %c0_i32 = arith.constant 0 : i32
    %c0_i32_0 = arith.constant 0 : i32
    %c0_i32_1 = arith.constant 0 : i32
    return %c0_i32, %c0_i32_0 : i32, i32
  }
  func.func @transform_11(%arg0: i32) -> (i32, i32) {
    %c0_i32 = arith.constant 0 : i32
    %c0_i32_0 = arith.constant 0 : i32
    %c0_i32_1 = arith.constant 0 : i32
    return %c0_i32, %c0_i32_0 : i32, i32
  }
  func.func @transform_12(%arg0: i32) -> (i32, i32) {
    %c0_i32 = arith.constant 0 : i32
    %c0_i32_0 = arith.constant 0 : i32
    %c0_i32_1 = arith.constant 0 : i32
    return %c0_i32, %c0_i32_0 : i32, i32
  }
  func.func @transform_13(%arg0: i32) -> (i32, i32) {
    %c0_i32 = arith.constant 0 : i32
    %c0_i32_0 = arith.constant 0 : i32
    %c0_i32_1 = arith.constant 0 : i32
    return %c0_i32, %c0_i32_0 : i32, i32
  }
}

</mosaic_0001>

<bundles_post_ra>
// kernel: tpu_custom_call.1
= control target key start
LH: loop header
LB: loop body
LE: loop exit
PB: predicated region body
PF: predicated region fallthrough
CT: control target
= control target key end

     0   :  { %v811_v0 = vmov 0   ;;  %v812_v2 = vmov 0.0|0.0   ;;  %vm69_vm0 = vcmask 1043456   ;;  %vm813_vm1 = vmmov 0   ;;  %s1078_s0 = inlined_call_operand.vmem [shape: s32[8,1], index: 0, kind: input, shape index: {}]   ;;  %s1079_s1 = inlined_call_operand.vmem [shape: s32[8,1], index: 1, kind: input, shape index: {}]   ;;  %s1080_s5 = inlined_call_operand.vmem [shape: f32[44,32], index: 5, kind: input, shape index: {}]   ;;  %s1081_s2 = inlined_call_operand.vmem [shape: f32[8,1], index: 2, kind: input, shape index: {}]   ;;  %s1082_s6 = inlined_call_operand.vmem [shape: f32[32,32], index: 6, kind: input, shape index: {}]   ;;  %s1083_s8 = inlined_call_operand.vmem [shape: f32[32,32], index: 8, kind: input, shape index: {}]   ;;  %s1084_s7 = inlined_call_operand.vmem [shape: f32[1,32], index: 7, kind: input, shape index: {}]   ;;  %s1085_s3 = inlined_call_operand.vmem [shape: s32[1,8], index: 3, kind: input, shape index: {}]   ;;  %s1086_s4 = inlined_call_operand.vmem [shape: s32[1,8], index: 4, kind: input, shape index: {}]   ;;  %s1087_s9 = inlined_call_operand.vmem [shape: f32[1,32], index: 9, kind: input, shape index: {}]   ;;  %s1088_s10 = inlined_call_operand.vmem [shape: f32[32,32], index: 10, kind: input, shape index: {}]   ;;  %s1089_s11 = inlined_call_operand.vmem [shape: f32[1,32], index: 11, kind: input, shape index: {}]   ;;  %s1090_s12 = inlined_call_operand.vmem [shape: f32[1,32], index: 12, kind: input, shape index: {}]   ;;  %s1091_s13 = inlined_call_operand.vmem [shape: f32[44,32], index: 13, kind: output, shape index: {}]  }
   0x1   :  { %809 = vset.pattern.permute.xlu0 %v811_v0  ;;  %v52_v1 = vld [vmem:[%s1078_s0] sm:$0xff]  ;;  %768 = vmatprep.subr.bf16.mxu1 %v812_v2  ;;  %v898_v4 = vld [vmem:[%s1080_s5 + $0x8] sm:$0xff]  ;;  %v903_v5 = vld [vmem:[%s1080_s5 + $0x10] sm:$0xff]  ;;  %v814_v12 = vmov 0.0   ;;  %vm815_vm2 = vmmov 1   ;;  %v50_v15 = vlaneseq  ;;  %vm65_vm6 = vcmask 359424  }
   0x2   :  { %v893_v3 = vld [vmem:[%s1080_s5] sm:$0xff]  ;;  %54 = vperm.xlu0 %809, %v52_v1   ;;  %v908_v6 = vld [vmem:[%s1080_s5 + $0x18] sm:$0xff]  ;;  %810 = vset.pattern.permute.xlu1 %v811_v0  ;;  %v926_v11 = vld [vmem:[%s1080_s5 + $0x28] sm:$0xf]  ;;  %vm161_vm8 = vcmask 261120   ;;  %vm367_vm14 = vcmask 64512  }
   0x3   :  { %v57_v7 = vld [vmem:[%s1079_s1] sm:$0xff]  ;;  %v769_v8 = vpack.c.bf16 %v898_v4, %v893_v3  ;;  %v772_v9 = vpack.c.bf16 %v908_v6, %v903_v5  ;;  %715 = vmatprep.mubr.msk.f32.mxu1 %vm813_vm1, %v814_v12  ;;  %vm776_vm3 = vmpackc.low %vm69_vm0, %vm815_vm2  ;;  %v51_v17 = vand.u32 127, %v50_v15  ;;  %v151_v19 = vld [vmem:[%s1082_s6 + $0x8] sm:$0xff]  ;;  %v321_v41 = vshrl.u32 %v50_v15, 7 }
   0x4   :  { %v921_v10 = vld [vmem:[%s1080_s5 + $0x20] sm:$0xff]  ;;  %v152_v23 = vld [vmem:[%s1082_s6 + $0x10] sm:$0xff]  ;;  %v153_v24 = vld [vmem:[%s1082_s6 + $0x18] sm:$0xff] }
   0x5   :  { %770 = vmatpush3.bf16.msra.mxu1 %v769_v8  ;;  %v775_v13 = vpack.c.bf16 %v926_v11, %v921_v10  ;;  %v143_v14 = vld [vmem:[%s1081_s2] sm:$0xff]  ;;  %v782_v25 = vpack.c.bf16 %v153_v24, %v152_v23  ;;  %v237_v27 = vld [vmem:[%s1083_s8 + $0x8] sm:$0xff]  ;;  %v238_v33 = vld [vmem:[%s1083_s8 + $0x10] sm:$0xff]  ;;  %v322_v44 = vadd.s32 8, %v321_v41  ;;  %v323_v47 = vadd.s32 16, %v321_v41 }
   0x6   :  { %59 = vperm.xlu0 %809, %v57_v7   ;;  %771 = vmatprep.subr.bf16.mxu1 %v812_v2  ;;  %v150_v18 = vld [vmem:[%s1082_s6] sm:$0xff]  ;;  %v239_v34 = vld [vmem:[%s1083_s8 + $0x18] sm:$0xff]  ;;  %v324_v48 = vadd.s32 24, %v321_v41  ;;  %v325_v51 = vadd.s32 32, %v321_v41  ;;  %v326_v52 = vadd.s32 40, %v321_v41  ;;  %v482_v57 = vld [vmem:[%s1088_s10 + $0x8] sm:$0xff] }
   0x7   :  { %146 = vperm.xlu1 %810, %v143_v14   ;;  %v779_v21 = vpack.c.bf16 %v151_v19, %v150_v18  ;;  %v236_v26 = vld [vmem:[%s1083_s8] sm:$0xff]  ;;  %v788_v35 = vpack.c.bf16 %v239_v34, %v238_v33  ;;  %v483_v59 = vld [vmem:[%s1088_s10 + $0x10] sm:$0xff]  ;;  %v484_v60 = vld [vmem:[%s1088_s10 + $0x18] sm:$0xff] }
   0x8   :  { %v785_v30 = vpack.c.bf16 %v237_v27, %v236_v26  ;;  %v643_v36 = vld [vmem:[%s1084_s7] ss:$0 sm:$0xff] }
   0x9   :  { %773 = vmatpush3.bf16.msra.mxu1 %v772_v9  ;;  %v647_v42 = vld [vmem:[%s1085_s3] ss:$0 sm:$0xff] }
   0xa   :  { %774 = vmatprep.subr.bf16.mxu1 %v812_v2  ;;  %v648_v43 = vld [vmem:[%s1086_s4] ss:$0 sm:$0xff]  ;;  %vm332_vm9 = vcmp.ge.s32.totalorder %v321_v41, %v647_v42  ;;  %vm333_vm12 = vcmp.ge.s32.totalorder %v322_v44, %v647_v42  ;;  %vm334_vm0 = vcmp.ge.s32.totalorder %v323_v47, %v647_v42 }
   0xb   :  { %vm343_vm10 = vcmp.lt.s32.totalorder %v321_v41, %v648_v43  ;;  %vm344_vm13 = vcmp.lt.s32.totalorder %v322_v44, %v648_v43  ;;  %v645_v55 = vld [vmem:[%s1087_s9] ss:$0 sm:$0xff] }
   0xc   :  { %vm349_vm11 = vmand %vm332_vm9, %vm343_vm10  ;;  %vm337_vm10 = vcmp.ge.s32.totalorder %v326_v52, %v647_v42  ;;  %v481_v56 = vld [vmem:[%s1088_s10] sm:$0xff] }
   0xd   :  { %777 = vmatpush3.bf16.msk.msra.mxu1 %vm776_vm3, %v775_v13  ;;  %v649_v45 = vsel %vm349_vm11, 1.0, %v814_v12  ;;  %vm981_vm15 = vmand %vm333_vm12, %vm344_vm13  ;;  %vm335_vm3 = vcmp.ge.s32.totalorder %v324_v48, %v647_v42  ;;  %vm348_vm11 = vcmp.lt.s32.totalorder %v326_v52, %v648_v43  ;;  %v790_v63 = vpack.c.bf16 %v482_v57, %v481_v56 }
   0xe   :  { %778 = vmatprep.subr.bf16.mxu1 %v812_v2  ;;  %742 = vmatprep.mubr.msk.f32.mxu0 %vm367_vm14, %v649_v45  ;;  %vm998_vm12 = vmand %vm337_vm10, %vm348_vm11  ;;  %v650_v0 = vsel %vm981_vm15, 1.0, %v814_v12  ;;  %vm634_vm13 = vcmask 257024  }
   0xf   :  { %v654_v9 = vsel %vm998_vm12, 1.0, %v814_v12 }
  0x81   :  { %v55_v16 = vpop.permute.xlu0 %54 }
  0x82   :  { %vm56_vm4 = vcmp.ge.s32.totalorder %v51_v17, %v55_v16 }
  0x85   :  { %v60_v20 = vpop.permute.xlu0 %59 }
  0x86   :  { %vm61_vm5 = vcmp.lt.s32.totalorder %v51_v17, %v60_v20  ;;  %v147_v28 = vpop.permute.xlu1 %146 }
  0x87   :  { %vm62_vm7 = vmand %vm56_vm4, %vm61_vm5  ;;  %vm346_vm4 = vcmp.lt.s32.totalorder %v324_v48, %v648_v43 }
  0x88   :  { %v640_v22 = vsel %vm62_vm7, 1.0, %v814_v12  ;;  %vm990_vm5 = vmand %vm335_vm3, %vm346_vm4  ;;  %vm347_vm7 = vcmp.lt.s32.totalorder %v325_v51, %v648_v43 }
  0x89   :  { %716 = vmatmul.mubr.msk.f32.vlgmr.msra.gmra.mrb[0].mxu1 %vm65_vm6, %v640_v22  ;;  %vm336_vm6 = vcmp.ge.s32.totalorder %v325_v51, %v647_v42  ;;  %v652_v7 = vsel %vm990_vm5, 1.0, %v814_v12 }
  0x8a   :  { %780 = vmatpush3.bf16.msra.mxu1 %v779_v21  ;;  %726 = vmatprep.mubr.msk.f32.mxu1 %vm813_vm1, %v814_v12  ;;  %vm994_vm9 = vmand %vm336_vm6, %vm347_vm7 }
  0x8b   :  { %781 = vmatprep.subr.bf16.mxu1 %v812_v2  ;;  %v653_v8 = vsel %vm994_vm9, 1.0, %v814_v12 }
  0x8e   :  { %783 = vmatpush3.bf16.msra.mxu1 %v782_v25 }
  0x8f   :  { %784 = vmatprep.subr.bf16.mxu1 %v812_v2 }
 0x15c   :  { %v139_v29 = vpop.f32.mrb[0].mxu1 }
 0x15d   :  { %v149_v31 = vmul.f32 %v147_v28, %v139_v29  ;;  %v717_v32 = vpop.f32.mrb[1].mxu1 }
 0x15f   :  { %727 = vmatmul.mubr.msk.f32.vlgmr.msra.gmra.mrb[2].mxu1 %vm161_vm8, %v149_v31 }
 0x160   :  { %786 = vmatpush3.bf16.msra.mxu1 %v785_v30  ;;  %737 = vmatprep.mubr.msk.f32.mxu1 %vm813_vm1, %v814_v12  ;;  %vm345_vm1 = vcmp.lt.s32.totalorder %v323_v47, %v648_v43 }
 0x161   :  { %787 = vmatprep.subr.bf16.mxu1 %v812_v2  ;;  %vm986_vm2 = vmand %vm334_vm0, %vm345_vm1  ;;  %v794_v2 = vpack.c.bf16 %v484_v60, %v483_v59 }
 0x162   :  { %v651_v1 = vsel %vm986_vm2, 1.0, %v814_v12  ;;  %v667_v12 = vld [vmem:[%s1089_s11] ss:$0 sm:$0xff] }
 0x164   :  { %789 = vmatpush3.bf16.msra.mxu1 %v788_v35 }
 0x232   :  { %v231_v37 = vpop.f32.mrb[2].mxu1 }
 0x233   :  { %v232_v38 = vadd.f32 %v643_v36, %v231_v37  ;;  %v728_v39 = vpop.f32.mrb[3].mxu1 }
 0x235   :  { %v235_v40 = vmax.f32 %v232_v38, 0.0 }
 0x237   :  { %738 = vmatmul.mubr.msk.f32.vlgmr.msra.gmra.mrb[4].mxu1 %vm161_vm8, %v235_v40 }
 0x30a   :  { %v316_v58 = vpop.f32.mrb[4].mxu1 }
 0x30b   :  { %v317_v61 = vadd.f32 %v645_v55, %v316_v58  ;;  %v739_v62 = vpop.f32.mrb[5].mxu1 }
 0x30d   :  { %740 = vmatprep.subr.mxu0 %v317_v61 }
 0x30e   :  { %741 = vmatpush3.msra.mxu0 %v317_v61 }
 0x30f   :  { %743 = vmatmul.mubr.msk.f32.vlgmr.msra.gmra.mrb[0].mxu0 %vm367_vm14, %v650_v0  ;;  %791 = vmatprep.subr.bf16.mxu0 %v790_v63 }
 0x310   :  { %793 = vmatpush3.bf16.msra.mxu0 %v790_v63  ;;  %745 = vmatprep.mubr.msk.f32.mxu0 %vm367_vm14, %v651_v1 }
 0x311   :  { %795 = vmatprep.subr.bf16.mxu0 %v794_v2 }
 0x313   :  { %746 = vmatmul.mubr.msk.f32.gmra.mrb[2].mxu0 %vm367_vm14, %v652_v7 }
 0x314   :  { %748 = vmatprep.mubr.msk.f32.mxu0 %vm367_vm14, %v653_v8  ;;  %797 = vmatpush3.bf16.msra.mxu0 %v794_v2 }
 0x317   :  { %749 = vmatmul.mubr.msk.f32.gmra.mrb[4].mxu0 %vm367_vm14, %v654_v9 }
 0x318   :  { %759 = vmatprep.mubr.msk.f32.mxu0 %vm161_vm8, %v893_v3 }
 0x31b   :  { %760 = vmatmul.mubr.msk.f32.vlgmr.msra.gmra.mrb[0].mxu0 %vm161_vm8, %v898_v4  ;;  %v668_v4 = vld [vmem:[%s1090_s12] ss:$0 sm:$0xff] }
 0x31c   :  { %762 = vmatprep.mubr.msk.f32.mxu0 %vm161_vm8, %v903_v5 }
 0x31f   :  { %763 = vmatmul.mubr.msk.f32.gmra.mrb[2].mxu0 %vm161_vm8, %v908_v6 }
 0x320   :  { %765 = vmatprep.mubr.msk.f32.mxu0 %vm161_vm8, %v921_v10 }
 0x323   :  { %766 = vmatmul.mubr.msk.f32.gmra.mrb[4].mxu0 %vm161_vm8, %v926_v11 }
 0x3ee   :  { %v761_v3 = vpop.f32.mrb[0].mxu0 }
 0x3ef   :  { %v605_v13 = vmul.f32 %v761_v3, %v667_v12  ;;  %v568_v5 = vpop.f32.mrb[1].mxu0 }
 0x3f0   :  { %v604_v14 = vmul.f32 %v667_v12, %v568_v5 }
 0x3f1   :  { %v618_v15 = vadd.f32 %v668_v4, %v605_v13 }
 0x3f2   :  { %v617_v6 = vadd.f32 %v668_v4, %v604_v14  ;;  %v764_v16 = vpop.f32.mrb[2].mxu0 }
 0x3f3   :  { %v624_v17 = vmax.f32 %v618_v15, 0.0  ;;  %v607_v10 = vmul.f32 %v764_v16, %v667_v12  ;;  %v578_v18 = vpop.f32.mrb[3].mxu0 }
 0x3f4   :  { %v623_v19 = vmax.f32 %v617_v6, 0.0  ;;  %v606_v11 = vmul.f32 %v667_v12, %v578_v18 }
 0x3f5   :  { %630 = vst.msk [vmem:[%s1091_s13 + $0x8] sm:$0xff] %vm161_vm8, %v624_v17  ;;  %v620_v20 = vadd.f32 %v668_v4, %v607_v10 }
 0x3f6   :  { %629 = vst.msk [vmem:[%s1091_s13] sm:$0xff] %vm161_vm8, %v623_v19  ;;  %v619_v21 = vadd.f32 %v668_v4, %v606_v11  ;;  %v767_v22 = vpop.f32.mrb[4].mxu0 }
 0x3f7   :  { %v626_v23 = vmax.f32 %v620_v20, 0.0  ;;  %v609_v24 = vmul.f32 %v767_v22, %v667_v12  ;;  %v588_v25 = vpop.f32.mrb[5].mxu0 }
 0x3f8   :  { %v625_v26 = vmax.f32 %v619_v21, 0.0  ;;  %v608_v27 = vmul.f32 %v667_v12, %v588_v25 }
 0x3f9   :  { %632 = vst.msk [vmem:[%s1091_s13 + $0x18] sm:$0xff] %vm161_vm8, %v626_v23  ;;  %v622_v28 = vadd.f32 %v668_v4, %v609_v24 }
 0x3fa   :  { %631 = vst.msk [vmem:[%s1091_s13 + $0x10] sm:$0xff] %vm161_vm8, %v625_v26  ;;  %v621_v29 = vadd.f32 %v668_v4, %v608_v27 }
 0x3fb   :  { %v628_v30 = vmax.f32 %v622_v28, 0.0 }
 0x3fc   :  { %v627_v31 = vmax.f32 %v621_v29, 0.0 }
 0x3fd   :  { %635 = vst.msk [vmem:[%s1091_s13 + $0x28] sm:$0xf] %vm634_vm13, %v628_v30 }
 0x3fe   :  { %633 = vst.msk [vmem:[%s1091_s13 + $0x20] sm:$0xff] %vm161_vm8, %v627_v31 }

</bundles_post_ra>
